<compile_context>
chip_gen: v6e
topology: v6e:2x2x1
jax: 0.10.0
libtpu: 0.0.40
codegen_flags: <defaults>
</compile_context>

<pallas_src>
import functools

import numpy as np

import jax
import jax.numpy as jnp
from jax.experimental import pallas as pl
from jax.experimental.pallas import tpu as pltpu


def _round_up(v, m):
    return (v + m - 1) // m * m


def _pick_tile(n_pad, target):
    """Largest multiple of 128 that divides n_pad and is <= target."""
    best = 128
    t = 128
    while t <= min(target, n_pad):
        if n_pad % t == 0:
            best = t
        t += 128
    return best


def _sage_layer_kernel(kids_ref, kcnt_ref, a_ref, xk_ref, xi_ref, dinv_ref,
                       wl_ref, wr_ref, b_ref, o_ref, acc_ref, *,
                       relu, num_samples, f_in_pad, f_out_pad):
    i = pl.program_id(0)
    k = pl.program_id(1)

    @pl.when(k == 0)
    def _():
        acc_ref[...] = jnp.zeros_like(acc_ref)

    # Neighborhood sum for this (row-tile, non-empty col-tile).  Padded slots
    # (k >= count for this row tile) reuse an already-fetched block index, so
    # they cost neither HBM bytes nor MXU time.
    @pl.when(k < kcnt_ref[i])
    def _():
        # int8 counts -> bf16 (exact for counts <= 127); two-step cast keeps
        # the lowering trivially supported and is VPU filler under the DMA.
        a = a_ref[...].astype(jnp.float32).astype(jnp.bfloat16)
        acc_ref[...] += jnp.dot(a, xk_ref[...],
                                preferred_element_type=jnp.float32)

    # Epilogue once per row tile: mean-normalize, per-sample weight matmuls,
    # bias, fused ReLU, lane-dense stores.
    @pl.when(k == pl.num_programs(1) - 1)
    def _():
        for s in range(num_samples):            # static unroll over samples
            agg = (acc_ref[:, s * f_in_pad:(s + 1) * f_in_pad]
                   * dinv_ref[...]).astype(jnp.bfloat16)
            h = (jnp.dot(agg, wl_ref[...], preferred_element_type=jnp.float32)
                 + jnp.dot(xi_ref[:, s * f_in_pad:(s + 1) * f_in_pad],
                           wr_ref[...], preferred_element_type=jnp.float32)
                 + b_ref[...])
            if relu:
                h = jnp.maximum(h, 0.0)
            o_ref[:, s * f_out_pad:(s + 1) * f_out_pad] = h.astype(o_ref.dtype)


def _sage_conv_layer(adj_i8, kids_np, kcounts_np, deg_inv, x_bf, w_l, w_r, b,
                     *, relu, last, num_samples, tile_m, tile_k):
    """One SAGEConv layer on padded, lane-dense, sample-batched operands."""
    n_pad = adj_i8.shape[0]
    f_in_tot = x_bf.shape[1]
    f_in_pad = f_in_tot // num_samples
    f_out_pad = w_l.shape[1]
    f_out_tot = num_samples * f_out_pad
    assert w_l.shape[0] == f_in_pad
    k_steps = kids_np.shape[1]
    grid = (n_pad // tile_m, k_steps)
    out_dtype = jnp.float32 if last else jnp.bfloat16

    nonempty = int(np.asarray(kcounts_np).sum())
    cost = pl.CostEstimate(
        flops=int(2 * nonempty * tile_m * tile_k * f_in_tot
                  + 4 * n_pad * f_in_tot * f_out_pad),
        transcendentals=0,
        bytes_accessed=int(nonempty * tile_m * tile_k * 1
                           + nonempty * tile_k * f_in_tot * 2
                           + n_pad * f_in_tot * 2
                           + 2 * f_in_pad * f_out_pad * 2
                           + n_pad * f_out_tot * (4 if last else 2)),
    )

    kernel = functools.partial(_sage_layer_kernel, relu=relu,
                               num_samples=num_samples,
                               f_in_pad=f_in_pad, f_out_pad=f_out_pad)

    # TODO(synk): if A-tile DMA latency is still exposed with very short k
    # loops, bump the A BlockSpec to pipeline_mode=pl.Buffered(3).
    return pl.pallas_call(
        kernel,
        out_shape=jax.ShapeDtypeStruct((n_pad, f_out_tot), out_dtype),
        grid_spec=pltpu.PrefetchScalarGridSpec(
            num_scalar_prefetch=2,
            grid=grid,
            in_specs=[
                # A tile: int8 counts, data-dependent col-tile index.
                pl.BlockSpec((tile_m, tile_k),
                             lambda i, k, kids, kcnt: (i, kids[i, k])),
                # x stream for aggregation (follows the non-empty col tiles).
                pl.BlockSpec((tile_k, f_in_tot),
                             lambda i, k, kids, kcnt: (kids[i, k], 0)),
                # x for the root term (k-invariant -> VMEM resident per tile).
                pl.BlockSpec((tile_m, f_in_tot),
                             lambda i, k, kids, kcnt: (i, 0)),
                # 1/deg.
                pl.BlockSpec((tile_m, 1),
                             lambda i, k, kids, kcnt: (i, 0)),
                # W_l, W_r, bias: grid-invariant, VMEM resident.
                pl.BlockSpec((f_in_pad, f_out_pad),
                             lambda i, k, kids, kcnt: (0, 0)),
                pl.BlockSpec((f_in_pad, f_out_pad),
                             lambda i, k, kids, kcnt: (0, 0)),
                pl.BlockSpec((1, f_out_pad),
                             lambda i, k, kids, kcnt: (0, 0)),
            ],
            out_specs=pl.BlockSpec((tile_m, f_out_tot),
                                   lambda i, k, kids, kcnt: (i, 0)),
            scratch_shapes=[pltpu.VMEM((tile_m, f_in_tot), jnp.float32)],
        ),
        compiler_params=pltpu.CompilerParams(
            dimension_semantics=("parallel", "arbitrary"),
            vmem_limit_bytes=48 * 1024 * 1024,   # fits v7x 64 MiB, ample v5e/v6e
        ),
        cost_estimate=cost,
    )(jnp.asarray(kids_np, jnp.int32), jnp.asarray(kcounts_np, jnp.int32),
      adj_i8, x_bf, x_bf, deg_inv, w_l, w_r, b)


def graphsage_forward(x, edge_index, params, final_activation=None,
                      tile_m_target=2048, tile_k_target=512):
    """GraphSAGENet forward.  x: (N, F0) or (S, N, F0); edge_index: (2, E).

    params: list of {"w_l": (F_in, F_out), "w_r": (F_in, F_out), "b": (1, F_out)}
    (weights stored as (in, out), i.e. the transpose of torch Linear.weight).
    """
    squeeze = False
    if x.ndim == 2:
        x = x[None]            # treat as one sample; batched path below
        squeeze = True
    num_samples, n, f0 = x.shape
    n_layers = len(params)
    f_last = params[-1]["w_l"].shape[1]

    # ---- glue (once per graph): padding, adjacency, degrees, sparsity map ---
    n_pad = _round_up(n, 128)                    # pad N only to 128
    tile_m = _pick_tile(n_pad, tile_m_target)
    tile_k = _pick_tile(n_pad, tile_k_target)

    src = jnp.asarray(edge_index[0], jnp.int32)
    dst = jnp.asarray(edge_index[1], jnp.int32)

    # int8 multiplicity counts (exact for <= 127 parallel edges per pair).
    adj = jnp.zeros((n_pad, n_pad), jnp.int32).at[dst, src].add(1)
    adj_i8 = jnp.clip(adj, 0, 127).astype(jnp.int8)
    deg = jnp.zeros((n_pad,), jnp.float32).at[dst].add(1.0)
    deg_inv = jnp.where(deg > 0, 1.0 / jnp.maximum(deg, 1.0), 0.0)[:, None]

    # Block-sparsity map: per row tile, compacted list of non-empty k tiles.
    # TODO(synk): uses concrete (host-side) edge_index; under jit fall back to
    # a dense k grid / CSR gather.
    src_np = np.asarray(jax.device_get(edge_index[0])).astype(np.int64)
    dst_np = np.asarray(jax.device_get(edge_index[1])).astype(np.int64)
    n_row_tiles = n_pad // tile_m
    n_col_tiles = n_pad // tile_k
    occ = np.zeros((n_row_tiles, n_col_tiles), dtype=bool)
    if src_np.size:
        occ[dst_np // tile_m, src_np // tile_k] = True
    kcounts = occ.sum(axis=1).astype(np.int32)
    k_steps = max(int(kcounts.max()) if kcounts.size else 0, 1)
    kids = np.zeros((n_row_tiles, k_steps), dtype=np.int32)
    for r in range(n_row_tiles):
        nz = np.flatnonzero(occ[r])
        kids[r, :nz.size] = nz                   # padded slots keep index 0

    # ---- pad features, batch samples along the lane axis, cast bf16 ---------
    fi_pad = _round_up(f0, 128)
    h = jnp.zeros((num_samples, n_pad, fi_pad), jnp.float32).at[:, :n, :f0].set(x)
    h = jnp.transpose(h, (1, 0, 2)).reshape(n_pad, num_samples * fi_pad)
    h = h.astype(jnp.bfloat16)

    for li, p in enumerate(params):
        f_in, f_out = p["w_l"].shape
        fi_pad = _round_up(f_in, 128)
        fo_pad = _round_up(f_out, 128)
        w_l = jnp.zeros((fi_pad, fo_pad), jnp.bfloat16
                        ).at[:f_in, :f_out].set(p["w_l"].astype(jnp.bfloat16))
        w_r = jnp.zeros((fi_pad, fo_pad), jnp.bfloat16
                        ).at[:f_in, :f_out].set(p["w_r"].astype(jnp.bfloat16))
        b = jnp.zeros((1, fo_pad), jnp.float32).at[:, :f_out].set(p["b"])
        # TODO(synk): when fo_pad < fi_pad, pre-transform x @ W_l in the
        # wrapper and aggregate A @ (xW_l) to shrink the N^2 term / accumulator.
        h = _sage_conv_layer(adj_i8, kids, kcounts, deg_inv, h, w_l, w_r, b,
                             relu=(li < n_layers - 1),
                             last=(li == n_layers - 1),
                             num_samples=num_samples,
                             tile_m=tile_m, tile_k=tile_k)

    fo_pad = _round_up(f_last, 128)
    out = h.reshape(n_pad, num_samples, fo_pad).transpose(1, 0, 2)[:, :n, :f_last]
    if final_activation is not None:
        out = final_activation(out)
    return out[0] if squeeze else out


def init_params(key, sizes):
    params = []
    for f_in, f_out in zip(sizes[:-1], sizes[1:]):
        key, k1, k2, k3 = jax.random.split(key, 4)
        scale = 1.0 / jnp.sqrt(jnp.float32(f_in))
        params.append({
            "w_l": jax.random.normal(k1, (f_in, f_out), jnp.float32) * scale,
            "w_r": jax.random.normal(k2, (f_in, f_out), jnp.float32) * scale,
            "b":   jax.random.normal(k3, (1, f_out), jnp.float32) * scale,
        })
    return params


def _reference_forward(x, edge_index, params, final_activation=None):
    """Pure-JAX reference mirroring the kernel's bf16 quantization points."""
    if x.ndim == 3:
        return jnp.stack([_reference_forward(x[i], edge_index, params,
                                             final_activation)
                          for i in range(x.shape[0])], axis=0)
    n = x.shape[0]
    src, dst = edge_index[0], edge_index[1]
    adj = jnp.zeros((n, n), jnp.float32).at[dst, src].add(1.0)
    deg = jnp.zeros((n,), jnp.float32).at[dst].add(1.0)
    deg_inv = jnp.where(deg > 0, 1.0 / jnp.maximum(deg, 1.0), 0.0)[:, None]
    bf = lambda t: t.astype(jnp.bfloat16).astype(jnp.float32)
    h = x
    for li, p in enumerate(params):
        hq = bf(h)                                   # kernel inputs are bf16
        agg = (adj @ hq) * deg_inv
        out = bf(agg) @ bf(p["w_l"]) + hq @ bf(p["w_r"]) + p["b"]
        if li < len(params) - 1:
            out = jnp.maximum(out, 0.0)
        h = out
    if final_activation is not None:
        h = final_activation(h)
    return h


if __name__ == "__main__":
    key = jax.random.PRNGKey(0)
    (k_x, k_e, k_p, k_x3, k_x2,
     k_e2a, k_e2b, k_e2c) = jax.random.split(key, 8)

    SIZES = (8, 32, 16)     # two SAGEConv layers with one ReLU in between
    N, E = 24, 64

    x = jax.random.normal(k_x, (N, SIZES[0]), jnp.float32)
    edge_index = jax.random.randint(k_e, (2, E), 0, N, dtype=jnp.int32)
    params = init_params(k_p, SIZES)

    # 2-D input path.
    out = jax.block_until_ready(graphsage_forward(x, edge_index, params))
    ref = _reference_forward(x, edge_index, params)
    assert out.shape == (N, SIZES[-1])
    err = float(jnp.max(jnp.abs(out - ref)))
    assert jnp.allclose(out, ref, atol=2e-2, rtol=2e-2), f"2D mismatch {err}"

    # 3-D (num_samples, N, F) path: samples batched along the lane axis, the
    # dense adjacency is streamed once per layer (not once per sample).
    x3 = jax.random.normal(k_x3, (2, N, SIZES[0]), jnp.float32)
    out3 = jax.block_until_ready(graphsage_forward(x3, edge_index, params))
    ref3 = _reference_forward(x3, edge_index, params)
    assert out3.shape == (2, N, SIZES[-1])
    assert jnp.allclose(out3, ref3, atol=2e-2, rtol=2e-2), "3D mismatch"

    # Block-sparse graph: two row tiles, one of them with zero in-edges and the
    # other touching two col tiles -> exercises the tile-skipping machinery.
    N2 = 200
    src2 = jnp.concatenate([jax.random.randint(k_e2a, (80,), 0, 96),
                            jax.random.randint(k_e2b, (16,), 128, N2)])
    dst2 = jax.random.randint(k_e2c, (96,), 0, 96)
    edge_index2 = jnp.stack([src2, dst2]).astype(jnp.int32)
    x2 = jax.random.normal(k_x2, (N2, SIZES[0]), jnp.float32)
    out2 = jax.block_until_ready(
        graphsage_forward(x2, edge_index2, params,
                          tile_m_target=128, tile_k_target=128))
    ref2 = _reference_forward(x2, edge_index2, params)
    assert out2.shape == (N2, SIZES[-1])
    assert jnp.allclose(out2, ref2, atol=2e-2, rtol=2e-2), "sparse mismatch"

    print("KERNEL_OK")
</pallas_src>

<mosaic_0001>
module attributes {stable_mosaic.version = 11 : i64} {
  func.func @_sage_layer_kernel(%arg0: i32, %arg1: i32, %arg2: memref<1x1xi32, #tpu.memory_space<smem>>, %arg3: memref<1xi32, #tpu.memory_space<smem>>, %arg4: memref<128x128xi8, #tpu.memory_space<vmem>>, %arg5: memref<128x128xbf16, #tpu.memory_space<vmem>>, %arg6: memref<128x128xbf16, #tpu.memory_space<vmem>>, %arg7: memref<128x1xf32, #tpu.memory_space<vmem>>, %arg8: memref<128x128xbf16, #tpu.memory_space<vmem>>, %arg9: memref<128x128xbf16, #tpu.memory_space<vmem>>, %arg10: memref<1x128xf32, #tpu.memory_space<vmem>>, %arg11: memref<128x128xbf16, #tpu.memory_space<vmem>>, %arg12: memref<128x128xf32, #tpu.memory_space<vmem>>) attributes {dimension_semantics = [#tpu.dimension_semantics<parallel>, #tpu.dimension_semantics<arbitrary>], iteration_bounds = array<i64: 1, 1>, scalar_prefetch = 2 : i64, scratch_operands = 1 : i64, tpu.core_type = #tpu.core_type<tc>, window_params = [{transform_indices = @transform_0, window_bounds = array<i64: 128, 128>}, {transform_indices = @transform_1, window_bounds = array<i64: 128, 128>}, {transform_indices = @transform_2, window_bounds = array<i64: 128, 128>}, {transform_indices = @transform_3, window_bounds = array<i64: 128, 1>}, {pipeline_mode = #tpu.pipeline_mode<synchronous>, transform_indices = @transform_4, window_bounds = array<i64: 128, 128>}, {pipeline_mode = #tpu.pipeline_mode<synchronous>, transform_indices = @transform_5, window_bounds = array<i64: 128, 128>}, {pipeline_mode = #tpu.pipeline_mode<synchronous>, transform_indices = @transform_6, window_bounds = array<i64: 1, 128>}, {transform_indices = @transform_7, window_bounds = array<i64: 128, 128>}]} {
    %c0_i32 = arith.constant 0 : i32
    %0 = arith.cmpi eq, %arg1, %c0_i32 : i32
    %1 = arith.extui %0 : i1 to i32
    %c0_i32_0 = arith.constant 0 : i32
    %2 = arith.cmpi ne, %1, %c0_i32_0 : i32
    scf.if %2 {
      %cst = arith.constant 0.000000e+00 : f32
      %11 = vector.broadcast %cst : f32 to vector<128x128xf32>
      %c0 = arith.constant 0 : index
      %c0_4 = arith.constant 0 : index
      %12 = vector.load %arg12[%c0, %c0_4] : memref<128x128xf32, #tpu.memory_space<vmem>>, vector<128x128xf32>
      tpu.vector_store %arg12[%c0, %c0_4], %11 {strides = array<i32>} : memref<128x128xf32, #tpu.memory_space<vmem>>, vector<128x128xf32>,
    } else {
    }
    %3 = arith.index_cast %arg0 : i32 to index
    %4 = memref.load %arg3[%3] : memref<1xi32, #tpu.memory_space<smem>>
    %5 = arith.cmpi slt, %arg1, %4 : i32
    %6 = arith.extui %5 : i1 to i32
    %c0_i32_1 = arith.constant 0 : i32
    %7 = arith.cmpi ne, %6, %c0_i32_1 : i32
    scf.if %7 {
      %c0 = arith.constant 0 : index
      %c0_4 = arith.constant 0 : index
      %11 = vector.load %arg4[%c0, %c0_4] : memref<128x128xi8, #tpu.memory_space<vmem>>, vector<128x128xi8>
      %12 = arith.sitofp %11 : vector<128x128xi8> to vector<128x128xf32>
      %13 = arith.truncf %12 : vector<128x128xf32> to vector<128x128xbf16>
      %c0_5 = arith.constant 0 : index
      %c0_6 = arith.constant 0 : index
      %14 = vector.load %arg12[%c0_5, %c0_6] : memref<128x128xf32, #tpu.memory_space<vmem>>, vector<128x128xf32>
      %c0_7 = arith.constant 0 : index
      %c0_8 = arith.constant 0 : index
      %15 = vector.load %arg5[%c0_7, %c0_8] : memref<128x128xbf16, #tpu.memory_space<vmem>>, vector<128x128xbf16>
      %cst = arith.constant dense<0.000000e+00> : vector<128x128xf32>
      %16 = tpu.matmul %13, %15, %cst {dimension_numbers = #tpu.dot_dimension_numbers<[1], [0], [0], [1], [0, 0, 1, 1], [], []>} : vector<128x128xbf16>, vector<128x128xbf16>, vector<128x128xf32> -> vector<128x128xf32>
      %17 = arith.addf %14, %16 : vector<128x128xf32>
      %c0_9 = arith.constant 0 : index
      %c0_10 = arith.constant 0 : index
      %18 = vector.load %arg12[%c0_9, %c0_10] : memref<128x128xf32, #tpu.memory_space<vmem>>, vector<128x128xf32>
      tpu.vector_store %arg12[%c0_9, %c0_10], %17 {strides = array<i32>} : memref<128x128xf32, #tpu.memory_space<vmem>>, vector<128x128xf32>,
    } else {
    }
    %c0_i32_2 = arith.constant 0 : i32
    %8 = arith.cmpi eq, %arg1, %c0_i32_2 : i32
    %9 = arith.extui %8 : i1 to i32
    %c0_i32_3 = arith.constant 0 : i32
    %10 = arith.cmpi ne, %9, %c0_i32_3 : i32
    scf.if %10 {
      %c0 = arith.constant 0 : index
      %c0_4 = arith.constant 0 : index
      %11 = vector.load %arg12[%c0, %c0_4] : memref<128x128xf32, #tpu.memory_space<vmem>>, vector<128x128xf32>
      %c0_5 = arith.constant 0 : index
      %c0_6 = arith.constant 0 : index
      %12 = vector.load %arg7[%c0_5, %c0_6] : memref<128x1xf32, #tpu.memory_space<vmem>>, vector<128x1xf32>
      %13 = vector.broadcast %12 : vector<128x1xf32> to vector<128x128xf32>
      %14 = arith.mulf %11, %13 : vector<128x128xf32>
      %15 = arith.truncf %14 : vector<128x128xf32> to vector<128x128xbf16>
      %c0_7 = arith.constant 0 : index
      %c0_8 = arith.constant 0 : index
      %16 = vector.load %arg8[%c0_7, %c0_8] : memref<128x128xbf16, #tpu.memory_space<vmem>>, vector<128x128xbf16>
      %cst = arith.constant dense<0.000000e+00> : vector<128x128xf32>
      %17 = tpu.matmul %15, %16, %cst {dimension_numbers = #tpu.dot_dimension_numbers<[1], [0], [0], [1], [0, 0, 1, 1], [], []>} : vector<128x128xbf16>, vector<128x128xbf16>, vector<128x128xf32> -> vector<128x128xf32>
      %c0_9 = arith.constant 0 : index
      %c0_10 = arith.constant 0 : index
      %18 = vector.load %arg6[%c0_9, %c0_10] : memref<128x128xbf16, #tpu.memory_space<vmem>>, vector<128x128xbf16>
      %c0_11 = arith.constant 0 : index
      %c0_12 = arith.constant 0 : index
      %19 = vector.load %arg9[%c0_11, %c0_12] : memref<128x128xbf16, #tpu.memory_space<vmem>>, vector<128x128xbf16>
      %cst_13 = arith.constant dense<0.000000e+00> : vector<128x128xf32>
      %20 = tpu.matmul %18, %19, %cst_13 {dimension_numbers = #tpu.dot_dimension_numbers<[1], [0], [0], [1], [0, 0, 1, 1], [], []>} : vector<128x128xbf16>, vector<128x128xbf16>, vector<128x128xf32> -> vector<128x128xf32>
      %21 = arith.addf %17, %20 : vector<128x128xf32>
      %c0_14 = arith.constant 0 : index
      %c0_15 = arith.constant 0 : index
      %22 = vector.load %arg10[%c0_14, %c0_15] : memref<1x128xf32, #tpu.memory_space<vmem>>, vector<1x128xf32>
      %23 = vector.broadcast %22 : vector<1x128xf32> to vector<128x128xf32>
      %24 = arith.addf %21, %23 : vector<128x128xf32>
      %cst_16 = arith.constant 0.000000e+00 : f32
      %25 = vector.broadcast %cst_16 : f32 to vector<128x128xf32>
      %26 = arith.maximumf %24, %25 : vector<128x128xf32>
      %27 = arith.truncf %26 : vector<128x128xf32> to vector<128x128xbf16>
      %c0_17 = arith.constant 0 : index
      %c0_18 = arith.constant 0 : index
      %28 = vector.load %arg11[%c0_17, %c0_18] : memref<128x128xbf16, #tpu.memory_space<vmem>>, vector<128x128xbf16>
      tpu.vector_store %arg11[%c0_17, %c0_18], %27 {strides = array<i32>} : memref<128x128xbf16, #tpu.memory_space<vmem>>, vector<128x128xbf16>,
    } else {
    }
    return
  }
  func.func @transform_0(%arg0: i32, %arg1: i32, %arg2: memref<1x1xi32, #tpu.memory_space<smem>>, %arg3: memref<1xi32, #tpu.memory_space<smem>>) -> (i32, i32) {
    %0 = arith.index_cast %arg0 : i32 to index
    %1 = arith.index_cast %arg1 : i32 to index
    %2 = memref.load %arg2[%0, %1] : memref<1x1xi32, #tpu.memory_space<smem>>
    %c0_i32 = arith.constant 0 : i32
    return %arg0, %2 : i32, i32
  }
  func.func @transform_1(%arg0: i32, %arg1: i32, %arg2: memref<1x1xi32, #tpu.memory_space<smem>>, %arg3: memref<1xi32, #tpu.memory_space<smem>>) -> (i32, i32) {
    %0 = arith.index_cast %arg0 : i32 to index
    %1 = arith.index_cast %arg1 : i32 to index
    %2 = memref.load %arg2[%0, %1] : memref<1x1xi32, #tpu.memory_space<smem>>
    %c0_i32 = arith.constant 0 : i32
    %c0_i32_0 = arith.constant 0 : i32
    return %2, %c0_i32 : i32, i32
  }
  func.func @transform_2(%arg0: i32, %arg1: i32, %arg2: memref<1x1xi32, #tpu.memory_space<smem>>, %arg3: memref<1xi32, #tpu.memory_space<smem>>) -> (i32, i32) {
    %c0_i32 = arith.constant 0 : i32
    %c0_i32_0 = arith.constant 0 : i32
    return %arg0, %c0_i32 : i32, i32
  }
  func.func @transform_3(%arg0: i32, %arg1: i32, %arg2: memref<1x1xi32, #tpu.memory_space<smem>>, %arg3: memref<1xi32, #tpu.memory_space<smem>>) -> (i32, i32) {
    %c0_i32 = arith.constant 0 : i32
    %c0_i32_0 = arith.constant 0 : i32
    return %arg0, %c0_i32 : i32, i32
  }
  func.func @transform_4(%arg0: i32, %arg1: i32, %arg2: memref<1x1xi32, #tpu.memory_space<smem>>, %arg3: memref<1xi32, #tpu.memory_space<smem>>) -> (i32, i32) {
    %c0_i32 = arith.constant 0 : i32
    %c0_i32_0 = arith.constant 0 : i32
    %c0_i32_1 = arith.constant 0 : i32
    return %c0_i32, %c0_i32_0 : i32, i32
  }
  func.func @transform_5(%arg0: i32, %arg1: i32, %arg2: memref<1x1xi32, #tpu.memory_space<smem>>, %arg3: memref<1xi32, #tpu.memory_space<smem>>) -> (i32, i32) {
    %c0_i32 = arith.constant 0 : i32
    %c0_i32_0 = arith.constant 0 : i32
    %c0_i32_1 = arith.constant 0 : i32
    return %c0_i32, %c0_i32_0 : i32, i32
  }
  func.func @transform_6(%arg0: i32, %arg1: i32, %arg2: memref<1x1xi32, #tpu.memory_space<smem>>, %arg3: memref<1xi32, #tpu.memory_space<smem>>) -> (i32, i32) {
    %c0_i32 = arith.constant 0 : i32
    %c0_i32_0 = arith.constant 0 : i32
    %c0_i32_1 = arith.constant 0 : i32
    return %c0_i32, %c0_i32_0 : i32, i32
  }
  func.func @transform_7(%arg0: i32, %arg1: i32, %arg2: memref<1x1xi32, #tpu.memory_space<smem>>, %arg3: memref<1xi32, #tpu.memory_space<smem>>) -> (i32, i32) {
    %c0_i32 = arith.constant 0 : i32
    %c0_i32_0 = arith.constant 0 : i32
    return %arg0, %c0_i32 : i32, i32
  }
}

</mosaic_0001>

<bundles_post_ra>
// kernel: tpu_custom_call.1
= control target key start
LH: loop header
LB: loop body
LE: loop exit
PB: predicated region body
PF: predicated region fallthrough
CT: control target
= control target key end

     0   :  { %16 = vsyncpa [#allocation7], 0  ;;  %s1653_s0 = inlined_call_operand.<no memory space> [shape: s32[1,1], index: 0, kind: input, shape index: {}]   ;;  %s1654_s1 = inlined_call_operand.<no memory space> [shape: s32[1], index: 1, kind: input, shape index: {}]   ;;  %s1655_s2 = inlined_call_operand.hbm [shape: s8[128,128], index: 2, kind: input, shape index: {}]   ;;  %s1656_s3 = inlined_call_operand.vmem [shape: bf16[128,128], index: 3, kind: input, shape index: {}]   ;;  %s1657_s4 = inlined_call_operand.vmem [shape: bf16[128,128], index: 4, kind: input, shape index: {}]   ;;  %s1658_s5 = inlined_call_operand.vmem [shape: f32[128,1], index: 5, kind: input, shape index: {}]   ;;  %s1659_s6 = inlined_call_operand.hbm [shape: bf16[128,128], index: 6, kind: input, shape index: {}]   ;;  %s1660_s7 = inlined_call_operand.hbm [shape: bf16[128,128], index: 7, kind: input, shape index: {}]   ;;  %s1661_s8 = inlined_call_operand.vmem [shape: f32[1,128], index: 8, kind: input, shape index: {}]   ;;  %s1662_s9 = inlined_call_operand.hbm [shape: bf16[128,128], index: 9, kind: output, shape index: {}]  }
   0x1   :  { %17 = vsyncpa [#allocation10], 0 }
   0x2   :  { %18 = vsyncpa [#allocation8], 0  ;;  %s1445_s30 = smov [#allocation9]   ;;  %s1036_s13 = sshll.u32 %s1653_s0, 7 }
   0x3   :  { %s62_s10 = sshll.u32 %s1445_s30, 4  ;;  %s63_s10 = int_to_ptr.vmem [resolvable:$true] %s62_s10 }
   0x4   :  { %s1365_s14 = scalar_lea.vmem %s63_s10, 1024  ;;  %p1370_p1 = scmp.lt.s32.totalorder %s63_s10, %s63_s10 }
   0x5   :  { %p1366_p0 = scmp.ne.s32.totalorder %s63_s10, %s1365_s14  ;;  %p1371_p2 = scmp.lt.s32.totalorder %s1365_s14, %s1365_s14 }
   0x7   :  { %p1372_p3 = por %p1371_p2, %p1370_p1 }
   0x9   :  { %p1373_p4 = pnand %p1372_p3, %p1366_p0 }
   0xb   :  { %1376 = shalt.err (!%p1373_p4)
}
   0xc   :  { %s1446_s15 = smov 64   ;;  %s1447_s16 = smov 4  }
   0xd   :  { %68 = dma.hbm_to_vmem [thread:$0]  %s1659_s6, 1024, %s63_s10, [#allocation10], %s1446_s15, %s1446_s15, %s1447_s16  }
   0xe   :  { %s29_s21 = scalar_lea.hbm %s1655_s2, %s1036_s13  ;;  %s1448_s22 = smov [#allocation6]  }
   0xf   :  { %s30_s23 = sshll.u32 %s1448_s22, 4  ;;  %s1377_s24 = scalar_lea.hbm %s29_s21, 512  ;;  %s31_s23 = int_to_ptr.vmem [resolvable:$true] %s30_s23 }
  0x10   :  { %p1378_p5 = scmp.ne.s32.totalorder %s29_s21, %s1377_s24  ;;  %s1379_s27 = scalar_lea.hbm %s1655_s2, 512 }
  0x11   :  { %p1380_p6 = scmp.lt.s32.totalorder %s29_s21, %s1655_s2  ;;  %p1381_p7 = scmp.lt.s32.totalorder %s1379_s27, %s1377_s24 }
  0x13   :  { %p1382_p8 = por %p1381_p7, %p1380_p6 }
  0x15   :  { %p1383_p9 = pnand %p1382_p8, %p1378_p5 }
  0x17   :  { %1386 = shalt.err (!%p1383_p9)
}
  0x18   :  { %s1387_s6 = scalar_lea.vmem %s31_s23, 512  ;;  %p1392_p11 = scmp.lt.s32.totalorder %s31_s23, %s31_s23 }
  0x19   :  { %p1388_p10 = scmp.ne.s32.totalorder %s31_s23, %s1387_s6  ;;  %p1393_p12 = scmp.lt.s32.totalorder %s1387_s6, %s1387_s6 }
  0x1b   :  { %p1394_p13 = por %p1393_p12, %p1392_p11 }
  0x1d   :  { %p1395_p0 = pnand %p1394_p13, %p1388_p10 }
  0x1f   :  { %1398 = shalt.err (!%p1395_p0)
}
  0x20   :  { %s1449_s30 = smov 128   ;;  %s1450_s10 = smov 8  }
  0x21   :  { %36 = dma.hbm_to_vmem [thread:$0]  %s29_s21, 512, %s31_s23, [#allocation7], %s1449_s30, %s1449_s30, %s1450_s10  }
  0x22   :  { %s1451_s11 = smov [#allocation11]  }
  0x23   :  { %s74_s12 = sshll.u32 %s1451_s11, 4  ;;  %s75_s12 = int_to_ptr.vmem [resolvable:$true] %s74_s12 }
  0x24   :  { %s1407_s13 = scalar_lea.vmem %s75_s12, 1024  ;;  %p1412_p2 = scmp.lt.s32.totalorder %s75_s12, %s75_s12 }
  0x25   :  { %p1408_p1 = scmp.ne.s32.totalorder %s75_s12, %s1407_s13  ;;  %p1413_p3 = scmp.lt.s32.totalorder %s1407_s13, %s1407_s13 }
  0x27   :  { %p1414_p4 = por %p1413_p3, %p1412_p2 }
  0x29   :  { %p1415_p5 = pnand %p1414_p4, %p1408_p1 }
  0x2b   :  { %1418 = shalt.err (!%p1415_p5)
}
  0x2c   :  { %80 = dma.hbm_to_vmem [thread:$0]  %s1660_s7, 1024, %s75_s12, [#allocation10], %s1446_s15, %s1446_s15, %s1447_s16  }
  0x2d   :  { %1439 = dma.done.wait [#allocation7], 512  }
  0x2e   :  { %1440 = vsyncadd [#allocation7], 4294966784 }
  0x2f   :  { %1441 = dma.done.wait [#allocation10], 2048  }
  0x30   :  { %1442 = vsyncadd [#allocation10], 4294965248  ;;  %s1037_s19 = sshll.u32 %s1653_s0, 4  ;;  %v1452_v0 = vmov 0.0   ;;  %p1040_p7 = scmp.le.s32.totalorder %s1654_s1, 0 }
  0x31   :  { %p1532_p6 = scmp.lt.s32.totalorder %s1037_s19, 15  ;;  %124 = vst [vmem:[#allocation2 + $0x30] sm:$0xff] %v1452_v0  ;;  %125 = vst [vmem:[#allocation2] sm:$0xff] %v1452_v0 }
  0x32   :  { %126 = vst [vmem:[#allocation2 + $0x58] sm:$0xff] %v1452_v0  ;;  %127 = vst [vmem:[#allocation2 + $0x18] sm:$0xff] %v1452_v0 }
  0x33   :  { %128 = vst [vmem:[#allocation2 + $0x50] sm:$0xff] %v1452_v0  ;;  %129 = vst [vmem:[#allocation2 + $0x68] sm:$0xff] %v1452_v0  ;;  %s1665_s19 = smov (!%p1532_p6, %s1037_s19), 15 }
  0x34   :  { %130 = vst [vmem:[#allocation2 + $0x8] sm:$0xff] %v1452_v0  ;;  %131 = vst [vmem:[#allocation2 + $0x48] sm:$0xff] %v1452_v0  ;;  %s1038_s0 = sshll.u32 %s1665_s19, 2  ;;  %144 = sbr.rel (%p1040_p7) target bundleno = 300 (0x12c), region = 49 }
  0x35   :  { %132 = vst [vmem:[#allocation2 + $0x40] sm:$0xff] %v1452_v0  ;;  %133 = vst [vmem:[#allocation2 + $0x20] sm:$0xff] %v1452_v0  ;;  %s1541_s22 = scalar_lea.vmem %s1656_s3, %s1038_s0 }
  0x36   :  { %134 = vst [vmem:[#allocation2 + $0x10] sm:$0xff] %v1452_v0  ;;  %135 = vst [vmem:[#allocation2 + $0x38] sm:$0xff] %v1452_v0 }
  0x37   :  { %136 = vst [vmem:[#allocation2 + $0x60] sm:$0xff] %v1452_v0  ;;  %137 = vst [vmem:[#allocation2 + $0x70] sm:$0xff] %v1452_v0 }
  0x38   :  { %138 = vst [vmem:[#allocation2 + $0x78] sm:$0xff] %v1452_v0  ;;  %139 = vst [vmem:[#allocation2 + $0x28] sm:$0xff] %v1452_v0 }
  0x39   :  { %v1323_v1 = vld [vmem:[%s1541_s22 + $0x38] sm:$0xff]   ;;  %v1324_v2 = vld [vmem:[%s1541_s22 + $0x30] sm:$0xff]   ;;  %v1325_v3 = vld [vmem:[%s1541_s22 + $0x28] sm:$0xff]  }
  0x3a   :  { %1201 = vmatprep.subr.bf16.mxu0 %v1323_v1  ;;  %1297 = vmatprep.subr.bf16.mxu1 %v1323_v1  ;;  %v1326_v4 = vld [vmem:[%s1541_s22 + $0x20] sm:$0xff]   ;;  %v147_v6 = vld [vmem:[#allocation6 + $0x10] sm:$0xff]  ;;  %v1327_v9 = vld [vmem:[%s1541_s22 + $0x18] sm:$0xff]  }
  0x3b   :  { %1202 = vmatpush3.bf16.msra.mxu0 %v1323_v1  ;;  %1305 = vmatpush3.bf16.msra.mxu1 %v1323_v1  ;;  %v145_v5 = vld [vmem:[#allocation6] sm:$0xff]  ;;  %v153_v8 = vunpack.c.l.s8.bf16 %v147_v6  ;;  %v1328_v10 = vld [vmem:[%s1541_s22 + $0x10] sm:$0xff]   ;;  %v1329_v11 = vld [vmem:[%s1541_s22 + $0x8] sm:$0xff]   ;;  %v154_v16 = vunpack.c.h.s8.bf16 %v147_v6 }
  0x3c   :  { %1203 = vmatprep.subr.bf16.mxu0 %v1324_v2  ;;  %1298 = vmatprep.subr.bf16.mxu1 %v1324_v2  ;;  %v149_v7 = vunpack.c.l.s8.bf16 %v145_v5  ;;  %v1330_v12 = vld [vmem:[%s1541_s22] sm:$0xff]   ;;  %v146_v13 = vld [vmem:[#allocation6 + $0x8] sm:$0xff]  ;;  %v148_v14 = vld [vmem:[#allocation6 + $0x18] sm:$0xff]  ;;  %v150_v15 = vunpack.c.h.s8.bf16 %v145_v5 }
  0x3d   :  { %1225 = vmatprep.mubr.bf16.mxu1 %v153_v8  ;;  %v151_v17 = vunpack.c.l.s8.bf16 %v146_v13  ;;  %v155_v18 = vunpack.c.l.s8.bf16 %v148_v14  ;;  %v152_v19 = vunpack.c.h.s8.bf16 %v146_v13  ;;  %v156_v20 = vunpack.c.h.s8.bf16 %v148_v14  ;;  %v159_v21 = vld [vmem:[#allocation2 + $0x58] sm:$0xff]  ;;  %v167_v22 = vld [vmem:[#allocation2 + $0x10] sm:$0xff]  ;;  %v165_v26 = vld [vmem:[#allocation2 + $0x40] sm:$0xff] }
  0x3e   :  { %1217 = vmatprep.mubr.bf16.mxu0 %v149_v7  ;;  %v157_v25 = vld [vmem:[#allocation2 + $0x30] sm:$0xff]  ;;  %v160_v31 = vld [vmem:[#allocation2 + $0x18] sm:$0xff]  ;;  %v158_v37 = vld [vmem:[#allocation2] sm:$0xff] }
  0x3f   :  { %1204 = vmatpush3.bf16.msra.mxu0 %v1324_v2  ;;  %1306 = vmatpush3.bf16.msra.mxu1 %v1324_v2  ;;  %v168_v32 = vld [vmem:[#allocation2 + $0x38] sm:$0xff]  ;;  %v166_v38 = vld [vmem:[#allocation2 + $0x20] sm:$0xff]  ;;  %v163_v43 = vld [vmem:[#allocation2 + $0x8] sm:$0xff] }
  0x40   :  { %1205 = vmatprep.subr.bf16.mxu0 %v1325_v3  ;;  %1299 = vmatprep.subr.bf16.mxu1 %v1325_v3  ;;  %v171_v44 = vld [vmem:[#allocation2 + $0x78] sm:$0xff]  ;;  %v161_v49 = vld [vmem:[#allocation2 + $0x50] sm:$0xff]  ;;  %v169_v50 = vld [vmem:[#allocation2 + $0x60] sm:$0xff] }
  0x41   :  { %v164_v55 = vld [vmem:[#allocation2 + $0x48] sm:$0xff]  ;;  %v170_v62 = vld [vmem:[#allocation2 + $0x70] sm:$0xff] }
  0x42   :  { %v172_v56 = vld [vmem:[#allocation2 + $0x28] sm:$0xff] }
  0x43   :  { %1206 = vmatpush3.bf16.msra.mxu0 %v1325_v3  ;;  %1307 = vmatpush3.bf16.msra.mxu1 %v1325_v3  ;;  %v162_v61 = vld [vmem:[#allocation2 + $0x68] sm:$0xff] }
  0x44   :  { %1207 = vmatprep.subr.bf16.mxu0 %v1326_v4  ;;  %1300 = vmatprep.subr.bf16.mxu1 %v1326_v4 }
  0x47   :  { %1208 = vmatpush3.bf16.msra.mxu0 %v1326_v4  ;;  %1308 = vmatpush3.bf16.msra.mxu1 %v1326_v4 }
  0x48   :  { %1209 = vmatprep.subr.bf16.mxu0 %v1327_v9  ;;  %1301 = vmatprep.subr.bf16.mxu1 %v1327_v9 }
  0x4b   :  { %1210 = vmatpush3.bf16.msra.mxu0 %v1327_v9  ;;  %1309 = vmatpush3.bf16.msra.mxu1 %v1327_v9 }
  0x4c   :  { %1211 = vmatprep.subr.bf16.mxu0 %v1328_v10  ;;  %1302 = vmatprep.subr.bf16.mxu1 %v1328_v10 }
  0x4f   :  { %1212 = vmatpush3.bf16.msra.mxu0 %v1328_v10  ;;  %1310 = vmatpush3.bf16.msra.mxu1 %v1328_v10 }
  0x50   :  { %1213 = vmatprep.subr.bf16.mxu0 %v1329_v11  ;;  %1303 = vmatprep.subr.bf16.mxu1 %v1329_v11 }
  0x53   :  { %1214 = vmatpush3.bf16.msra.mxu0 %v1329_v11  ;;  %1311 = vmatpush3.bf16.msra.mxu1 %v1329_v11 }
  0x54   :  { %1215 = vmatprep.subr.bf16.mxu0 %v1330_v12  ;;  %1304 = vmatprep.subr.bf16.mxu1 %v1330_v12 }
  0x57   :  { %1216 = vmatpush3.bf16.msra.mxu0 %v1330_v12  ;;  %1312 = vmatpush3.bf16.msra.mxu1 %v1330_v12 }
  0x5a   :  { %1218 = vmatmul.mubr.bf16.vlgmr.msra.gmra.mxu0 %v150_v15  ;;  %1226 = vmatmul.mubr.bf16.vlgmr.msra.gmra.mxu1 %v154_v16 }
  0x5b   :  { %1221 = vmatprep.mubr.bf16.mxu0 %v151_v17  ;;  %1229 = vmatprep.mubr.bf16.mxu1 %v155_v18 }
  0x62   :  { %1222 = vmatmul.mubr.bf16.gmra.mxu0 %v152_v19  ;;  %1230 = vmatmul.mubr.bf16.gmra.mxu1 %v156_v20 }
 0x11a   :  { %v1219_v23 = vpop.f32.mrf.mxu0  ;;  %v1227_v24 = vpop.f32.mrf.mxu1 }
 0x11b   :  { %v336_v27 = vadd.f32 %v1219_v23, %v159_v21  ;;  %v344_v28 = vadd.f32 %v1227_v24, %v167_v22 }
 0x11c   :  { %v271_v29 = vpop.f32.mrf.mxu0  ;;  %v303_v30 = vpop.f32.mrf.mxu1 }
 0x11d   :  { %352 = vst [vmem:[#allocation2 + $0x58] sm:$0xff] %v336_v27  ;;  %360 = vst [vmem:[#allocation2 + $0x10] sm:$0xff] %v344_v28  ;;  %v334_v33 = vadd.f32 %v271_v29, %v157_v25  ;;  %v342_v34 = vadd.f32 %v303_v30, %v165_v26 }
 0x11e   :  { %v1220_v35 = vpop.f32.mrf.mxu0  ;;  %v1228_v36 = vpop.f32.mrf.mxu1 }
 0x11f   :  { %350 = vst [vmem:[#allocation2 + $0x30] sm:$0xff] %v334_v33  ;;  %358 = vst [vmem:[#allocation2 + $0x40] sm:$0xff] %v342_v34  ;;  %v337_v39 = vadd.f32 %v1220_v35, %v160_v31  ;;  %v345_v40 = vadd.f32 %v1228_v36, %v168_v32 }
 0x120   :  { %v274_v41 = vpop.f32.mrf.mxu0  ;;  %v306_v42 = vpop.f32.mrf.mxu1 }
 0x121   :  { %353 = vst [vmem:[#allocation2 + $0x18] sm:$0xff] %v337_v39  ;;  %361 = vst [vmem:[#allocation2 + $0x38] sm:$0xff] %v345_v40  ;;  %v335_v45 = vadd.f32 %v274_v41, %v158_v37  ;;  %v343_v46 = vadd.f32 %v306_v42, %v166_v38 }
 0x122   :  { %v1223_v47 = vpop.f32.mrf.mxu0  ;;  %v1231_v48 = vpop.f32.mrf.mxu1 }
 0x123   :  { %351 = vst [vmem:[#allocation2] sm:$0xff] %v335_v45  ;;  %359 = vst [vmem:[#allocation2 + $0x20] sm:$0xff] %v343_v46  ;;  %v340_v51 = vadd.f32 %v1223_v47, %v163_v43  ;;  %v348_v52 = vadd.f32 %v1231_v48, %v171_v44 }
 0x124   :  { %v287_v53 = vpop.f32.mrf.mxu0  ;;  %v319_v54 = vpop.f32.mrf.mxu1 }
 0x125   :  { %356 = vst [vmem:[#allocation2 + $0x8] sm:$0xff] %v340_v51  ;;  %364 = vst [vmem:[#allocation2 + $0x78] sm:$0xff] %v348_v52  ;;  %v338_v57 = vadd.f32 %v287_v53, %v161_v49  ;;  %v346_v58 = vadd.f32 %v319_v54, %v169_v50 }
 0x126   :  { %v1224_v59 = vpop.f32.mrf.mxu0  ;;  %v1232_v60 = vpop.f32.mrf.mxu1 }
 0x127   :  { %354 = vst [vmem:[#allocation2 + $0x50] sm:$0xff] %v338_v57  ;;  %362 = vst [vmem:[#allocation2 + $0x60] sm:$0xff] %v346_v58  ;;  %v341_v63 = vadd.f32 %v1224_v59, %v164_v55  ;;  %v349_v0 = vadd.f32 %v1232_v60, %v172_v56 }
 0x128   :  { %v290_v1 = vpop.f32.mrf.mxu0  ;;  %v322_v2 = vpop.f32.mrf.mxu1 }
 0x129   :  { %357 = vst [vmem:[#allocation2 + $0x48] sm:$0xff] %v341_v63  ;;  %365 = vst [vmem:[#allocation2 + $0x28] sm:$0xff] %v349_v0  ;;  %v339_v3 = vadd.f32 %v290_v1, %v162_v61  ;;  %v347_v4 = vadd.f32 %v322_v2, %v170_v62 }
 0x12b   :  { %355 = vst [vmem:[#allocation2 + $0x68] sm:$0xff] %v339_v3  ;;  %363 = vst [vmem:[#allocation2 + $0x70] sm:$0xff] %v347_v4 }
 0x12c PF:  { %v387_v5 = vld [vmem:[%s1658_s5 + $0x10] sm:$0xff]  ;;  %v385_v6 = vld [vmem:[%s1658_s5] sm:$0xff]  ;;  %v1453_v7 = vmov 0   ;;  %v388_v8 = vld [vmem:[%s1658_s5 + $0x18] sm:$0xff] }
 0x12d   :  { %1332 = vset.pattern.permute.xlu1 %v1453_v7  ;;  %1331 = vset.pattern.permute.xlu0 %v1453_v7  ;;  %v386_v9 = vld [vmem:[%s1658_s5 + $0x8] sm:$0xff]  ;;  %v389_v11 = vld [vmem:[%s1658_s5 + $0x20] sm:$0xff]  ;;  %v1333_v12 = vld [vmem:[#allocation11 + $0x38] sm:$0xff]  }
 0x12e   :  { %413 = vperm.xlu1 %1332, %v387_v5   ;;  %403 = vperm.xlu0 %1331, %v385_v6   ;;  %v390_v10 = vld [vmem:[%s1658_s5 + $0x28] sm:$0xff]  ;;  %v1334_v13 = vld [vmem:[#allocation11 + $0x30] sm:$0xff]   ;;  %v1335_v14 = vld [vmem:[#allocation9 + $0x38] sm:$0xff]  }
 0x12f   :  { %1233 = vmatprep.subr.bf16.mxu0 %v1333_v12  ;;  %v392_v15 = vld [vmem:[%s1658_s5 + $0x38] sm:$0xff]  ;;  %v391_v16 = vld [vmem:[%s1658_s5 + $0x30] sm:$0xff]  ;;  %1265 = vmatprep.subr.bf16.mxu1 %v1335_v14  ;;  %v1336_v18 = vld [vmem:[#allocation11 + $0x28] sm:$0xff]  }
 0x130   :  { %1234 = vmatpush3.bf16.msra.mxu0 %v1333_v12  ;;  %v1337_v17 = vld [vmem:[#allocation9 + $0x30] sm:$0xff]   ;;  %1266 = vmatpush3.bf16.msra.mxu1 %v1335_v14  ;;  %v394_v19 = vld [vmem:[%s1658_s5 + $0x48] sm:$0xff]  ;;  %v393_v21 = vld [vmem:[%s1658_s5 + $0x40] sm:$0xff] }
 0x131   :  { %1235 = vmatprep.subr.bf16.mxu0 %v1334_v13  ;;  %1267 = vmatprep.subr.bf16.mxu1 %v1337_v17  ;;  %v1339_v20 = vld [vmem:[#allocation9 + $0x28] sm:$0xff]   ;;  %v1338_v22 = vld [vmem:[#allocation11 + $0x20] sm:$0xff]   ;;  %v396_v24 = vld [vmem:[%s1658_s5 + $0x58] sm:$0xff] }
 0x132   :  { %418 = vperm.xlu1 %1332, %v388_v8   ;;  %408 = vperm.xlu0 %1331, %v386_v9   ;;  %v1341_v23 = vld [vmem:[#allocation9 + $0x20] sm:$0xff]   ;;  %v395_v25 = vld [vmem:[%s1658_s5 + $0x50] sm:$0xff]  ;;  %v1340_v26 = vld [vmem:[#allocation11 + $0x18] sm:$0xff]  }
 0x133   :  { %v1343_v27 = vld [vmem:[#allocation9 + $0x18] sm:$0xff]   ;;  %v1348_v28 = vld [vmem:[%s1657_s4] sm:$0xff]   ;;  %v398_v29 = vld [vmem:[%s1658_s5 + $0x68] sm:$0xff] }
 0x134   :  { %1236 = vmatpush3.bf16.msra.mxu0 %v1334_v13  ;;  %1268 = vmatpush3.bf16.msra.mxu1 %v1337_v17  ;;  %v397_v30 = vld [vmem:[%s1658_s5 + $0x60] sm:$0xff]  ;;  %v1342_v31 = vld [vmem:[#allocation11 + $0x10] sm:$0xff]   ;;  %v400_v33 = vld [vmem:[%s1658_s5 + $0x78] sm:$0xff] }
 0x135   :  { %1237 = vmatprep.subr.bf16.mxu0 %v1336_v18  ;;  %1269 = vmatprep.subr.bf16.mxu1 %v1339_v20  ;;  %v1345_v32 = vld [vmem:[#allocation9 + $0x10] sm:$0xff]   ;;  %v1344_v35 = vld [vmem:[#allocation11 + $0x8] sm:$0xff]   ;;  %v1346_v37 = vld [vmem:[#allocation11] sm:$0xff]  }
 0x136   :  { %428 = vperm.xlu1 %1332, %v390_v10   ;;  %423 = vperm.xlu0 %1331, %v389_v11   ;;  %v399_v34 = vld [vmem:[%s1658_s5 + $0x70] sm:$0xff]  ;;  %v1347_v36 = vld [vmem:[#allocation9 + $0x8] sm:$0xff]   ;;  %v1350_v38 = vld [vmem:[#allocation9] sm:$0xff]  }
 0x137   :  { %1249 = vmatprep.mubr.bf16.mxu0 %v1348_v28  ;;  %v1349_v39 = vld [vmem:[%s1657_s4 + $0x8] sm:$0xff]   ;;  %v1351_v40 = vld [vmem:[%s1657_s4 + $0x10] sm:$0xff]   ;;  %v1352_v41 = vld [vmem:[%s1657_s4 + $0x18] sm:$0xff]  }
 0x138   :  { %1238 = vmatpush3.bf16.msra.mxu0 %v1336_v18  ;;  %1270 = vmatpush3.bf16.msra.mxu1 %v1339_v20  ;;  %v1353_v42 = vld [vmem:[%s1657_s4 + $0x20] sm:$0xff]   ;;  %v1354_v43 = vld [vmem:[%s1657_s4 + $0x28] sm:$0xff]   ;;  %v1355_v44 = vld [vmem:[%s1657_s4 + $0x30] sm:$0xff]  }
 0x139   :  { %1239 = vmatprep.subr.bf16.mxu0 %v1338_v22  ;;  %1271 = vmatprep.subr.bf16.mxu1 %v1341_v23  ;;  %v1356_v45 = vld [vmem:[%s1657_s4 + $0x38] sm:$0xff]   ;;  %v369_v49 = vld [vmem:[#allocation2 + $0x30] sm:$0xff]  ;;  %v370_v51 = vld [vmem:[#allocation2] sm:$0xff] }
 0x13a   :  { %438 = vperm.xlu1 %1332, %v392_v15   ;;  %433 = vperm.xlu0 %1331, %v391_v16   ;;  %v371_v48 = vld [vmem:[#allocation2 + $0x58] sm:$0xff]  ;;  %v374_v58 = vld [vmem:[#allocation2 + $0x68] sm:$0xff]  ;;  %v373_v59 = vld [vmem:[#allocation2 + $0x50] sm:$0xff] }
 0x13b   :  { %v372_v50 = vld [vmem:[#allocation2 + $0x18] sm:$0xff]  ;;  %v376_v2 = vld [vmem:[#allocation2 + $0x48] sm:$0xff]  ;;  %v378_v9 = vld [vmem:[#allocation2 + $0x20] sm:$0xff] }
 0x13c   :  { %1240 = vmatpush3.bf16.msra.mxu0 %v1338_v22  ;;  %1272 = vmatpush3.bf16.msra.mxu1 %v1341_v23  ;;  %v375_v3 = vld [vmem:[#allocation2 + $0x8] sm:$0xff]  ;;  %v377_v10 = vld [vmem:[#allocation2 + $0x40] sm:$0xff]  ;;  %v380_v16 = vld [vmem:[#allocation2 + $0x38] sm:$0xff] }
 0x13d   :  { %1241 = vmatprep.subr.bf16.mxu0 %v1340_v26  ;;  %1273 = vmatprep.subr.bf16.mxu1 %v1343_v27  ;;  %v379_v17 = vld [vmem:[#allocation2 + $0x10] sm:$0xff] }
 0x13e   :  { %448 = vperm.xlu1 %1332, %v394_v19   ;;  %443 = vperm.xlu0 %1331, %v393_v21   ;;  %v382_v23 = vld [vmem:[#allocation2 + $0x70] sm:$0xff] }
 0x140   :  { %1242 = vmatpush3.bf16.msra.mxu0 %v1340_v26  ;;  %1274 = vmatpush3.bf16.msra.mxu1 %v1343_v27 }
 0x141   :  { %1243 = vmatprep.subr.bf16.mxu0 %v1342_v31  ;;  %1275 = vmatprep.subr.bf16.mxu1 %v1345_v32 }
 0x142   :  { %458 = vperm.xlu1 %1332, %v396_v24   ;;  %453 = vperm.xlu0 %1331, %v395_v25   ;;  %v381_v24 = vld [vmem:[#allocation2 + $0x60] sm:$0xff] }
 0x144   :  { %1244 = vmatpush3.bf16.msra.mxu0 %v1342_v31  ;;  %1276 = vmatpush3.bf16.msra.mxu1 %v1345_v32  ;;  %v383_v31 = vld [vmem:[#allocation2 + $0x78] sm:$0xff] }
 0x145   :  { %1245 = vmatprep.subr.bf16.mxu0 %v1344_v35  ;;  %1277 = vmatprep.subr.bf16.mxu1 %v1347_v36 }
 0x146   :  { %468 = vperm.xlu1 %1332, %v398_v29   ;;  %463 = vperm.xlu0 %1331, %v397_v30   ;;  %v384_v30 = vld [vmem:[#allocation2 + $0x28] sm:$0xff] }
 0x148   :  { %1246 = vmatpush3.bf16.msra.mxu0 %v1344_v35  ;;  %1278 = vmatpush3.bf16.msra.mxu1 %v1347_v36 }
 0x149   :  { %1247 = vmatprep.subr.bf16.mxu0 %v1346_v37  ;;  %1279 = vmatprep.subr.bf16.mxu1 %v1350_v38 }
 0x14a   :  { %478 = vperm.xlu1 %1332, %v400_v33   ;;  %473 = vperm.xlu0 %1331, %v399_v34  }
 0x14c   :  { %1248 = vmatpush3.bf16.msra.mxu0 %v1346_v37  ;;  %1280 = vmatpush3.bf16.msra.mxu1 %v1350_v38 }
 0x14f   :  { %1250 = vmatmul.mubr.bf16.vlgmr.msra.gmra.mxu0 %v1349_v39 }
 0x150   :  { %1253 = vmatprep.mubr.bf16.mxu0 %v1351_v40 }
 0x157   :  { %1254 = vmatmul.mubr.bf16.gmra.mxu0 %v1352_v41 }
 0x158   :  { %1257 = vmatprep.mubr.bf16.mxu0 %v1353_v42 }
 0x15f   :  { %1258 = vmatmul.mubr.bf16.gmra.mxu0 %v1354_v43 }
 0x160   :  { %1261 = vmatprep.mubr.bf16.mxu0 %v1355_v44 }
 0x167   :  { %1262 = vmatmul.mubr.bf16.gmra.mxu0 %v1356_v45 }
 0x1a9   :  { %v414_v46 = vpop.permute.xlu1 %413  ;;  %v404_v47 = vpop.permute.xlu0 %403 }
 0x1aa   :  { %v483_v54 = vmul.f32 %v414_v46, %v371_v48  ;;  %v481_v55 = vmul.f32 %v404_v47, %v369_v49  ;;  %v1629_v48 = vld [vmem:[%s1661_s8] ss:$0 sm:$0xff]  ;;  %s1454_s8 = smov [#allocation12]  }
 0x1ab   :  { %s1015_s23 = sshll.u32 %s1454_s8, 4  ;;  %s1016_s23 = int_to_ptr.vmem [resolvable:$true] %s1015_s23 }
 0x1ac   :  { %s1419_s24 = scalar_lea.vmem %s1016_s23, 1024  ;;  %p1424_p9 = scmp.lt.s32.totalorder %s1016_s23, %s1016_s23 }
 0x1ad   :  { %v419_v52 = vpop.permute.xlu1 %418  ;;  %v409_v53 = vpop.permute.xlu0 %408  ;;  %p1420_p8 = scmp.ne.s32.totalorder %s1016_s23, %s1419_s24  ;;  %p1425_p10 = scmp.lt.s32.totalorder %s1419_s24, %s1419_s24 }
 0x1ae   :  { %v484_v56 = vmul.f32 %v419_v52, %v372_v50  ;;  %v482_v57 = vmul.f32 %v409_v53, %v370_v51 }
 0x1af   :  { %p1426_p11 = por %p1425_p10, %p1424_p9 }
 0x1b0   :  { %v498_v60 = vpack.c.bf16 %v484_v56, %v483_v54  ;;  %v497_v61 = vpack.c.bf16 %v482_v57, %v481_v55 }
 0x1b1   :  { %v429_v62 = vpop.permute.xlu1 %428  ;;  %v424_v63 = vpop.permute.xlu0 %423  ;;  %p1427_p12 = pnand %p1426_p11, %p1420_p8 }
 0x1b2   :  { %v486_v0 = vmul.f32 %v429_v62, %v374_v58  ;;  %v485_v1 = vmul.f32 %v424_v63, %v373_v59  ;;  %1281 = vmatprep.mubr.bf16.mxu1 %v497_v61 }
 0x1b3   :  { %1282 = vmatmul.mubr.bf16.vlgmr.msra.gmra.mxu1 %v498_v60 }
 0x1b4   :  { %v499_v4 = vpack.c.bf16 %v486_v0, %v485_v1 }
 0x1b5   :  { %v439_v5 = vpop.permute.xlu1 %438  ;;  %v434_v6 = vpop.permute.xlu0 %433 }
 0x1b6   :  { %v488_v7 = vmul.f32 %v439_v5, %v376_v2  ;;  %v487_v8 = vmul.f32 %v434_v6, %v375_v3  ;;  %1285 = vmatprep.mubr.bf16.mxu1 %v499_v4 }
 0x1b8   :  { %v500_v11 = vpack.c.bf16 %v488_v7, %v487_v8 }
 0x1b9   :  { %v449_v12 = vpop.permute.xlu1 %448  ;;  %v444_v13 = vpop.permute.xlu0 %443 }
 0x1ba   :  { %v490_v14 = vmul.f32 %v449_v12, %v378_v9  ;;  %v489_v15 = vmul.f32 %v444_v13, %v377_v10 }
 0x1bb   :  { %1286 = vmatmul.mubr.bf16.gmra.mxu1 %v500_v11 }
 0x1bc   :  { %v501_v18 = vpack.c.bf16 %v490_v14, %v489_v15 }
 0x1bd   :  { %v459_v19 = vpop.permute.xlu1 %458  ;;  %v454_v20 = vpop.permute.xlu0 %453 }
 0x1be   :  { %v492_v21 = vmul.f32 %v459_v19, %v380_v16  ;;  %v491_v22 = vmul.f32 %v454_v20, %v379_v17  ;;  %1289 = vmatprep.mubr.bf16.mxu1 %v501_v18 }
 0x1c0   :  { %v502_v25 = vpack.c.bf16 %v492_v21, %v491_v22 }
 0x1c1   :  { %v469_v26 = vpop.permute.xlu1 %468  ;;  %v464_v27 = vpop.permute.xlu0 %463 }
 0x1c2   :  { %v494_v28 = vmul.f32 %v469_v26, %v382_v23  ;;  %v493_v29 = vmul.f32 %v464_v27, %v381_v24 }
 0x1c3   :  { %1290 = vmatmul.mubr.bf16.gmra.mxu1 %v502_v25 }
 0x1c4   :  { %v503_v32 = vpack.c.bf16 %v494_v28, %v493_v29 }
 0x1c5   :  { %v479_v33 = vpop.permute.xlu1 %478  ;;  %v474_v34 = vpop.permute.xlu0 %473 }
 0x1c6   :  { %v496_v35 = vmul.f32 %v479_v33, %v384_v30  ;;  %v495_v36 = vmul.f32 %v474_v34, %v383_v31  ;;  %1293 = vmatprep.mubr.bf16.mxu1 %v503_v32 }
 0x1c8   :  { %v504_v37 = vpack.c.bf16 %v496_v35, %v495_v36 }
 0x1cb   :  { %1294 = vmatmul.mubr.bf16.gmra.mxu1 %v504_v37 }
 0x20f   :  { %v1251_v38 = vpop.f32.mrf.mxu0 }
 0x211   :  { %v683_v39 = vpop.f32.mrf.mxu0 }
 0x213   :  { %v1252_v40 = vpop.f32.mrf.mxu0 }
 0x215   :  { %v686_v41 = vpop.f32.mrf.mxu0 }
 0x217   :  { %v1255_v42 = vpop.f32.mrf.mxu0 }
 0x219   :  { %v699_v43 = vpop.f32.mrf.mxu0 }
 0x21b   :  { %v1256_v44 = vpop.f32.mrf.mxu0 }
 0x21d   :  { %v702_v45 = vpop.f32.mrf.mxu0 }
 0x21f   :  { %v1259_v50 = vpop.f32.mrf.mxu0 }
 0x221   :  { %v715_v56 = vpop.f32.mrf.mxu0 }
 0x223   :  { %v1260_v2 = vpop.f32.mrf.mxu0 }
 0x225   :  { %v718_v12 = vpop.f32.mrf.mxu0 }
 0x227   :  { %v1263_v21 = vpop.f32.mrf.mxu0 }
 0x229   :  { %v731_v31 = vpop.f32.mrf.mxu0 }
 0x273   :  { %v1283_v46 = vpop.f32.mrf.mxu1 }
 0x274   :  { %v837_v47 = vadd.f32 %v1283_v46, %v1251_v38 }
 0x275   :  { %v828_v49 = vpop.f32.mrf.mxu1 }
 0x276   :  { %v829_v51 = vadd.f32 %v828_v49, %v683_v39  ;;  %v900_v53 = vadd.f32 %v1629_v48, %v837_v47 }
 0x277   :  { %v1284_v52 = vpop.f32.mrf.mxu1 }
 0x278   :  { %v840_v54 = vadd.f32 %v1284_v52, %v1252_v40  ;;  %v898_v57 = vadd.f32 %v1629_v48, %v829_v51  ;;  %v916_v61 = vmax.f32 %v900_v53, 0.0 }
 0x279   :  { %v831_v55 = vpop.f32.mrf.mxu1 }
 0x27a   :  { %v901_v58 = vadd.f32 %v1629_v48, %v840_v54  ;;  %v832_v59 = vadd.f32 %v831_v55, %v686_v41  ;;  %v914_v3 = vmax.f32 %v898_v57, 0.0  ;;  %v1264_v41 = vpop.f32.mrf.mxu0 }
 0x27b   :  { %v1287_v60 = vpop.f32.mrf.mxu1 }
 0x27c   :  { %v917_v62 = vmax.f32 %v901_v58, 0.0  ;;  %v899_v63 = vadd.f32 %v1629_v48, %v832_v59  ;;  %v853_v0 = vadd.f32 %v1287_v60, %v1255_v42  ;;  %v734_v52 = vpop.f32.mrf.mxu0 }
 0x27d   :  { %v844_v1 = vpop.f32.mrf.mxu1 }
 0x27e   :  { %v1114_v4 = vpack.c.bf16 %v917_v62, %v916_v61  ;;  %v915_v5 = vmax.f32 %v899_v63, 0.0  ;;  %v845_v6 = vadd.f32 %v844_v1, %v699_v43  ;;  %v904_v9 = vadd.f32 %v1629_v48, %v853_v0 }
 0x27f   :  { %v1288_v7 = vpop.f32.mrf.mxu1 }
 0x280   :  { %1146 = vst [vmem:[#allocation12 + $0x8] sm:$0xff] %v1114_v4   ;;  %v1109_v8 = vpack.c.bf16 %v915_v5, %v914_v3  ;;  %v856_v10 = vadd.f32 %v1288_v7, %v1256_v44  ;;  %v902_v13 = vadd.f32 %v1629_v48, %v845_v6  ;;  %v920_v17 = vmax.f32 %v904_v9, 0.0 }
 0x281   :  { %v847_v11 = vpop.f32.mrf.mxu1 }
 0x282   :  { %1110 = vst [vmem:[#allocation12] sm:$0xff] %v1109_v8   ;;  %v905_v14 = vadd.f32 %v1629_v48, %v856_v10  ;;  %v848_v15 = vadd.f32 %v847_v11, %v702_v45  ;;  %v918_v23 = vmax.f32 %v902_v13, 0.0 }
 0x283   :  { %v1291_v16 = vpop.f32.mrf.mxu1 }
 0x284   :  { %v921_v18 = vmax.f32 %v905_v14, 0.0  ;;  %v903_v19 = vadd.f32 %v1629_v48, %v848_v15  ;;  %v869_v20 = vadd.f32 %v1291_v16, %v1259_v50 }
 0x285   :  { %v860_v22 = vpop.f32.mrf.mxu1 }
 0x286   :  { %v1124_v24 = vpack.c.bf16 %v921_v18, %v920_v17  ;;  %v919_v25 = vmax.f32 %v903_v19, 0.0  ;;  %v861_v26 = vadd.f32 %v860_v22, %v715_v56  ;;  %v908_v29 = vadd.f32 %v1629_v48, %v869_v20 }
 0x287   :  { %v1292_v27 = vpop.f32.mrf.mxu1 }
 0x288   :  { %1148 = vst [vmem:[#allocation12 + $0x18] sm:$0xff] %v1124_v24   ;;  %v1119_v28 = vpack.c.bf16 %v919_v25, %v918_v23  ;;  %v872_v30 = vadd.f32 %v1292_v27, %v1260_v2  ;;  %v906_v33 = vadd.f32 %v1629_v48, %v861_v26  ;;  %v924_v37 = vmax.f32 %v908_v29, 0.0 }
 0x289   :  { %v863_v32 = vpop.f32.mrf.mxu1 }
 0x28a   :  { %1147 = vst [vmem:[#allocation12 + $0x10] sm:$0xff] %v1119_v28   ;;  %v909_v34 = vadd.f32 %v1629_v48, %v872_v30  ;;  %v864_v35 = vadd.f32 %v863_v32, %v718_v12  ;;  %v922_v43 = vmax.f32 %v906_v33, 0.0 }
 0x28b   :  { %v1295_v36 = vpop.f32.mrf.mxu1 }
 0x28c   :  { %v925_v38 = vmax.f32 %v909_v34, 0.0  ;;  %v907_v39 = vadd.f32 %v1629_v48, %v864_v35  ;;  %v885_v40 = vadd.f32 %v1295_v36, %v1263_v21 }
 0x28d   :  { %v876_v42 = vpop.f32.mrf.mxu1 }
 0x28e   :  { %v1134_v44 = vpack.c.bf16 %v925_v38, %v924_v37  ;;  %v923_v45 = vmax.f32 %v907_v39, 0.0  ;;  %v877_v46 = vadd.f32 %v876_v42, %v731_v31  ;;  %v912_v50 = vadd.f32 %v1629_v48, %v885_v40 }
 0x28f   :  { %v1296_v47 = vpop.f32.mrf.mxu1 }
 0x290   :  { %1150 = vst [vmem:[#allocation12 + $0x28] sm:$0xff] %v1134_v44   ;;  %v1129_v49 = vpack.c.bf16 %v923_v45, %v922_v43  ;;  %v888_v51 = vadd.f32 %v1296_v47, %v1264_v41  ;;  %v910_v54 = vadd.f32 %v1629_v48, %v877_v46  ;;  %v928_v57 = vmax.f32 %v912_v50, 0.0 }
 0x291   :  { %v879_v53 = vpop.f32.mrf.mxu1 }
 0x292   :  { %1149 = vst [vmem:[#allocation12 + $0x20] sm:$0xff] %v1129_v49   ;;  %v913_v55 = vadd.f32 %v1629_v48, %v888_v51  ;;  %v880_v56 = vadd.f32 %v879_v53, %v734_v52  ;;  %v926_v60 = vmax.f32 %v910_v54, 0.0 }
 0x294   :  { %v929_v58 = vmax.f32 %v913_v55, 0.0  ;;  %v911_v59 = vadd.f32 %v1629_v48, %v880_v56 }
 0x296   :  { %v1144_v61 = vpack.c.bf16 %v929_v58, %v928_v57  ;;  %v927_v62 = vmax.f32 %v911_v59, 0.0 }
 0x298   :  { %1152 = vst [vmem:[#allocation12 + $0x38] sm:$0xff] %v1144_v61   ;;  %v1139_v63 = vpack.c.bf16 %v927_v62, %v926_v60 }
 0x29a   :  { %1151 = vst [vmem:[#allocation12 + $0x30] sm:$0xff] %v1139_v63  }
 0x29b   :  { %1430 = shalt.err (!%p1427_p12)
}
 0x29c   :  { %1021 = dma.vmem_to_hbm [thread:$0]  %s1016_s23, 1024, %s1662_s9, [#allocation8], %s1446_s15, %s1446_s15, %s1447_s16  }
 0x29d   :  { %1443 = dma.done.wait [#allocation8], 1024  }
 0x29e   :  { %1444 = vsyncadd [#allocation8], 4294966272 }
 0x29f   :  { %1025 = vsyncpa [#allocation7], 1 }
 0x2a0   :  { %1026 = vsyncpa [#allocation10], 1 }
 0x2a1   :  { %1027 = vsyncpa [#allocation8], 1 }

</bundles_post_ra>
